<compile_context>
chip_gen: v7x
topology: tpu7x:2x2x1
jax: 0.10.0
libtpu: 0.0.40
codegen_flags: <defaults>
</compile_context>

<pallas_src>
import math

import jax
import jax.numpy as jnp
from jax.experimental import pallas as pl
from jax.experimental.pallas import tpu as pltpu

_LANE = 128                      # vreg lane width (last-dim granularity)
_SUBLANE = 8                     # vreg sublanes for 32-bit dtypes
_MAX_TF = 2048                   # cap on lane-tile width
_TARGET_BLOCK_BYTES = 1 << 20    # ~1 MiB per block


def _repeat_copy_kernel(x_ref, o_ref):
    # Grid step (i, j, r): copy input tile (i, j) into output slab r.
    o_ref[...] = x_ref[...]


def _choose_tf(fp: int) -> int:
    """Largest multiple of 128 that divides fp, capped at _MAX_TF."""
    best = _LANE
    t = _LANE
    while t <= min(fp, _MAX_TF):
        if fp % t == 0:
            best = t
        t += _LANE
    return best


def _choose_tb(b: int, tf: int, itemsize: int) -> int:
    """Row-tile: multiple of the sublane pack (or the full B if B is small)."""
    sub = _SUBLANE * max(1, 4 // itemsize)   # 8 (f32), 16 (bf16), 32 (int8/fp8)
    if b <= sub:
        return b                             # full-dim block -> always legal
    target = max(sub, _TARGET_BLOCK_BYTES // (tf * itemsize))
    tb = min(target, b)
    tb = (tb // sub) * sub
    return max(sub, tb)


def repeat_pallas(x: jax.Array, rep: int) -> jax.Array:
    """Equivalent of Repeat(rep).forward(x): (B, *rest) -> (B, rep, *rest)."""
    orig_shape = x.shape
    B = orig_shape[0]
    rest = orig_shape[1:]
    F = math.prod(rest) if rest else 1
    itemsize = jnp.dtype(x.dtype).itemsize

    x2d = x.reshape(B, F)

    # Pad the flattened feature dim to a multiple of 128 (lane-dense output).
    Fp = ((F + _LANE - 1) // _LANE) * _LANE
    if Fp != F:
        x2d = jnp.pad(x2d, ((0, 0), (0, Fp - F)))

    tf = _choose_tf(Fp)                 # multiple of 128, divides Fp exactly
    tb = _choose_tb(B, tf, itemsize)    # multiple of sublane pack, or == B
    nb = pl.cdiv(B, tb)                 # edge B-block (if any) is auto-masked
    nf = Fp // tf                       # exact

    grid = (nb, nf, rep)                # rep innermost: input block index is
                                        # constant across consecutive steps,
                                        # so x stays resident in VMEM.

    out_flat = pl.pallas_call(
        _repeat_copy_kernel,
        out_shape=jax.ShapeDtypeStruct((B, rep * Fp), x.dtype),
        grid_spec=pltpu.PrefetchScalarGridSpec(
            num_scalar_prefetch=0,
            grid=grid,
            in_specs=[pl.BlockSpec((tb, tf), lambda i, j, r: (i, j))],
            out_specs=pl.BlockSpec((tb, tf), lambda i, j, r: (i, r * nf + j)),
        ),
        compiler_params=pltpu.CompilerParams(
            dimension_semantics=("parallel", "parallel", "arbitrary"),
        ),
        cost_estimate=pl.CostEstimate(
            flops=0,
            transcendentals=0,
            bytes_accessed=(1 + rep) * B * Fp * itemsize,
        ),
    )(x2d)

    # Row-major: out_flat[:, r*Fp:(r+1)*Fp] == x2d, so this reshape reproduces
    # exactly x.view(B, 1, *rest).repeat(1, rep, 1, ..., 1).
    out = out_flat.reshape(B, rep, Fp)
    if Fp != F:
        # TODO(synk): for F not a multiple of 128 this slice costs one extra XLA pass.
        out = out[:, :, :F]
    return out.reshape((B, rep) + rest)


if __name__ == "__main__":
    key = jax.random.PRNGKey(0)
    k0, k1 = jax.random.split(key)

    # Main test: small NCHW image input, rep=3 (F = 4*16*16 = 1024, lane-aligned).
    B, C, H, W = 2, 4, 16, 16
    rep = 3
    x = jax.random.normal(k0, (B, C, H, W), dtype=jnp.float32)

    out = jax.block_until_ready(repeat_pallas(x, rep))
    ref = jnp.broadcast_to(x[:, None, ...], (B, rep, C, H, W))
    assert out.shape == (B, rep, C, H, W), out.shape
    assert out.dtype == x.dtype
    assert bool(jnp.array_equal(out, ref)), "mismatch vs reference (aligned F)"

    # Secondary test: non-128-aligned feature size exercises the padding path.
    x2 = jax.random.normal(k1, (2, 3, 5, 7), dtype=jnp.float32)
    out2 = jax.block_until_ready(repeat_pallas(x2, 2))
    ref2 = jnp.broadcast_to(x2[:, None, ...], (2, 2, 3, 5, 7))
    assert out2.shape == (2, 2, 3, 5, 7), out2.shape
    assert bool(jnp.array_equal(out2, ref2)), "mismatch vs reference (padded F)"

    print("KERNEL_OK")
</pallas_src>

<mosaic_0001>
module attributes {stable_mosaic.version = 11 : i64} {
  func.func @_repeat_copy_kernel(%arg0: i32, %arg1: i32, %arg2: i32, %arg3: memref<2x1024xf32, #tpu.memory_space<vmem>>, %arg4: memref<2x1024xf32, #tpu.memory_space<vmem>>) attributes {dimension_semantics = [#tpu.dimension_semantics<parallel>, #tpu.dimension_semantics<parallel>, #tpu.dimension_semantics<arbitrary>], iteration_bounds = array<i64: 1, 1, 3>, scalar_prefetch = 0 : i64, scratch_operands = 0 : i64, tpu.core_type = #tpu.core_type<tc>, window_params = [{transform_indices = @transform_0, window_bounds = array<i64: 2, 1024>}, {transform_indices = @transform_1, window_bounds = array<i64: 2, 1024>}]} {
    %c0 = arith.constant 0 : index
    %c0_0 = arith.constant 0 : index
    %0 = vector.load %arg3[%c0, %c0_0] : memref<2x1024xf32, #tpu.memory_space<vmem>>, vector<2x1024xf32>
    %c0_1 = arith.constant 0 : index
    %c0_2 = arith.constant 0 : index
    %1 = vector.load %arg4[%c0_1, %c0_2] : memref<2x1024xf32, #tpu.memory_space<vmem>>, vector<2x1024xf32>
    tpu.vector_store %arg4[%c0_1, %c0_2], %0 {strides = array<i32>} : memref<2x1024xf32, #tpu.memory_space<vmem>>, vector<2x1024xf32>,
    return
  }
  func.func @transform_0(%arg0: i32, %arg1: i32, %arg2: i32) -> (i32, i32) {
    %c0_i32 = arith.constant 0 : i32
    return %arg0, %arg1 : i32, i32
  }
  func.func @transform_1(%arg0: i32, %arg1: i32, %arg2: i32) -> (i32, i32) {
    %c1_i32 = arith.constant 1 : i32
    %0 = arith.muli %arg2, %c1_i32 : i32
    %1 = arith.addi %0, %arg1 : i32
    %c0_i32 = arith.constant 0 : i32
    return %arg0, %1 : i32, i32
  }
}

</mosaic_0001>

<bundles_post_ra>
// kernel: tpu_custom_call.1
= control target key start
LH: loop header
LB: loop body
LE: loop exit
PB: predicated region body
PF: predicated region fallthrough
CT: control target
= control target key end

     0   :  { %6 = vsyncpa [#allocation3], 0  ;;  %s595_s0 = inlined_call_operand.hbm [shape: f32[2,1024], index: 0, kind: input, shape index: {}]   ;;  %s596_s1 = inlined_call_operand.hbm [shape: f32[2,3072], index: 1, kind: output, shape index: {}]  }
   0x1   :  { %7 = vsyncpa [#allocation4], 0 }
   0x2   :  { %9 = vsyncpa [#allocation4 + $0x1], 0  ;;  %s450_s6 = smov 0   ;;  %s452_s7 = smov 0  }
   0x3   :  { %s454_s8 = smov 0   ;;  %s456_s9 = smov 0  }
   0x4   :  { %s458_s10 = smov 0   ;;  %s460_s11 = smov 0  }
   0x5 LB: > { %s247_s12 = sadd.s32 4294967295, %s436_s11   ;;  %s248_s13 = sadd.s32 4294967294, %s436_s11   ;;  %s436_s11 = sphi %s460_s11, %s15_s11   ;;  %s432_s10 = sphi %s458_s10, %s614_s10   ;;  %s428_s9 = sphi %s456_s9, %s613_s9   ;;  %s424_s8 = sphi %s454_s8, %s612_s8   ;;  %s420_s7 = sphi %s452_s7, %s611_s7   ;;  %s416_s6 = sphi %s450_s6, %s610_s6  }
   0x6   : > { %s27_s14 = sadd.s32 1, %s432_s10  ;;  %s73_s15 = sadd.s32 1, %s424_s8 }
   0x7   : > { %p28_p0 = scmp.ge.s32.totalorder %s27_s14, 3  ;;  %p83_p1 = scmp.ne.s32.totalorder %s424_s8, %s420_s7 }
   0x8   : > { %p84_p2 = scmp.eq.s32.totalorder %s247_s12, 2  ;;  %p89_p3 = scmp.ne.s32.totalorder %s420_s7, %s416_s6 }
   0x9   : > { %s616_s14 = smov (%p28_p0, %s27_s14), 0  ;;  %p90_p5 = scmp.eq.s32.totalorder %s248_s13, 2 }
   0xa   : > { %p490_p4 = por %p84_p2, %p83_p1  ;;  %s69_s17 = ssub.s32 %s432_s10, %s616_s14 }
   0xb   : > { %p249_p6 = scmp.ge.s32.totalorder %s436_s11, 1  ;;  %p71_p7 = scmp.eq.s32.totalorder %s69_s17, 0 }
   0xc   : > { %s601_s16 = scalar_select %p490_p4, 1, 0 }
   0xd   : > { %p497_p8 = por %p90_p5, %p89_p3  ;;  %p97_p9 = scmp.lt.s32.totalorder %s436_s11, 4 }
   0xe   : > { %s503_s19 = scalar_select %p71_p7, %s424_s8, %s73_s15  }
   0xf   : > { %s602_s18 = scalar_select %p497_p8, 1, 0 }
  0x10   : > { %p505_p10 = pnand %p249_p6, %p97_p9  ;;  %p509_p11 = scmp.eq.s32.totalorder %s247_s12, 0 }
  0x11   : > { %s438_s22 = smov [#allocation2]   ;;  %s326_s27 = scalar_lea.hbm %s595_s0, 256 }
  0x12   : > { %s603_s20 = scalar_select %p505_p10, 1, 0 }
  0x13   : > { %s604_s21 = scalar_select %p509_p11, 1, 0 }
  0x14   : > { %p266_p12 = pneg %p505_p10  ;;  %s115_s23 = sshll.u32 %s438_s22, 4  ;;  %s116_s23 = int_to_ptr.vmem [resolvable:$true] %s115_s23 }
  0x15   : > { %p327_p0 = scmp.ne.s32.totalorder %s595_s0, %s326_s27  ;;  %p333_p5 = scmp.lt.u32.totalorder %s326_s27, %s595_s0 }
  0x16   : > { %p517_p13 = pnand %p509_p11, %p266_p12 }
  0x18   : > { %p328_p1 = pneg %p517_p13 }
  0x1a   : > { %p329_p2 = pnand %p328_p1, %p327_p0 }
  0x1c   : > { %p330_p3 = pneg %p329_p2 }
  0x1e   : > { %p335_p6 = pnand %p333_p5, %p330_p3 }
  0x20   : > { %338 = shalt.err (!%p335_p6)
}
  0x21   : > { %s339_s3 = scalar_lea.vmem %s116_s23, 256  ;;  %p347_p8 = scmp.lt.s32.totalorder %s116_s23, %s116_s23 }
  0x22   : > { %p340_p7 = scmp.ne.s32.totalorder %s116_s23, %s339_s3  ;;  %p348_p4 = scmp.lt.s32.totalorder %s339_s3, %s339_s3 }
  0x24   : > { %p342_p9 = pnand %p340_p7, %p328_p1  ;;  %p349_p11 = por %p348_p4, %p347_p8 }
  0x26   : > { %p343_p12 = pneg %p342_p9 }
  0x28   : > { %p350_p10 = pnand %p349_p11, %p343_p12 }
  0x2a   : > { %353 = shalt.err (!%p350_p10)
}
  0x2b   : > { %269 = dma.hbm_to_vmem [thread:$0]  (!%p517_p13), %s595_s0, 256, %s116_s23, [#allocation3]  }
  0x2c   : > { %p606_p0 = scmp.ne.s32.totalorder %s603_s20, 0 }
  0x2d   : > { %p607_p2 = scmp.ne.s32.totalorder (!%p606_p0), %s604_s21, 0 }
  0x2e   : > { %128 = sbr.rel (%p606_p0) target bundleno = 80 (0x50), region = 24 }
  0x35   : > { %407 = dma.done.wait (%p607_p2), [#allocation3], 256  }
  0x36   : > { %409 = vsyncadd (%p607_p2), [#allocation3], 4294967040  ;;  %s140_s12 = sand.u32 1, %s420_s7   ;;  %s259_s22 = sshll.u32 %s428_s9, 8  ;;  %v146_v0 = vld [vmem:[#allocation2] sm:$0xff]  ;;  %v147_v1 = vld [vmem:[#allocation2 + $0x8] sm:$0xff] }
  0x37   : > { %s253_s13 = sshll.u32 %s140_s12, 4  ;;  %s550_s20 = scalar_lea.hbm %s596_s1, %s259_s22 }
  0x38   : > { %s142_s15 = scalar_lea.vmem [#allocation5], %s253_s13  ;;  %s151_s21 = scalar_lea.sflag [#allocation4], %s140_s12 }
  0x39   : > { %s168_s17 = sshll.u32 %s142_s15, 4  ;;  %148 = vst [vmem:[%s142_s15] sm:$0xff] %v146_v0  ;;  %149 = vst [vmem:[%s142_s15 + $0x8] sm:$0xff] %v147_v1  ;;  %p608_p8 = scmp.ne.s32.totalorder %s601_s16, 0  ;;  %s545_s17 = int_to_ptr.vmem [resolvable:$true] %s168_s17 }
  0x3a   : > { %s354_s25 = scalar_lea.vmem %s545_s17, 256  ;;  %s439_s9 = smov [#allocation5]  }
  0x3b   : > { %p355_p4 = scmp.ne.s32.totalorder %s545_s17, %s354_s25  ;;  %s358_s26 = sshll.u32 %s439_s9, 4  ;;  %s359_s26 = int_to_ptr.vmem [resolvable:$false] %s358_s26 }
  0x3c   : > { %s360_s27 = scalar_lea.vmem %s359_s26, 512  ;;  %p361_p13 = scmp.lt.s32.totalorder %s545_s17, %s359_s26 }
  0x3d   : > { %p356_p10 = pnand %p355_p4, %p608_p8  ;;  %p362_p1 = scmp.lt.s32.totalorder %s360_s27, %s354_s25 }
  0x3f   : > { %p357_p11 = pneg %p356_p10  ;;  %p363_p3 = por %p362_p1, %p361_p13 }
  0x41   : > { %p364_p5 = pnand %p363_p3, %p357_p11 }
  0x43   : > { %367 = shalt.err (!%p364_p5)
}
  0x44   : > { %s368_s28 = scalar_lea.hbm %s550_s20, 256  ;;  %s372_s2 = scalar_lea.hbm %s596_s1, 768 }
  0x45   : > { %p369_p6 = scmp.ne.s32.totalorder %s550_s20, %s368_s28  ;;  %p373_p12 = scmp.lt.u32.totalorder %s550_s20, %s596_s1 }
  0x46   : > { %p374_p0 = scmp.lt.u32.totalorder %s372_s2, %s368_s28  ;;  %p376_p4 = scmp.lt.u32.totalorder %s368_s28, %s550_s20 }
  0x47   : > { %p370_p7 = pnand %p369_p6, %p608_p8 }
  0x48   : > { %p375_p2 = por %p374_p0, %p373_p12 }
  0x49   : > { %p371_p9 = pneg %p370_p7 }
  0x4a   : > { %p377_p10 = por %p376_p4, %p375_p2 }
  0x4c   : > { %p378_p11 = pnand %p377_p10, %p371_p9 }
  0x4e   : > { %381 = shalt.err (!%p378_p11)
}
  0x4f   : > { %264 = dma.vmem_to_hbm [thread:$0]  (%p608_p8), %s545_s17, 256, %s550_s20, %s151_s21  }
  0x50 PF: > { %p276_p13 = scmp.ge.s32.totalorder %s436_s11, 2  ;;  %s180_s5 = sand.u32 1, %s416_s6  }
  0x51   : > { %p609_p1 = scmp.ne.s32.totalorder %s602_s18, 0  ;;  %s181_s12 = scalar_lea.sflag [#allocation4], %s180_s5 }
  0x53   : > { %p271_p3 = pnand %p276_p13, %p609_p1 }
  0x55   : > { %411 = dma.done.wait (!%p271_p3), %s181_s12, 256  }
  0x56   : > { %413 = vsyncadd (!%p271_p3), %s181_s12, 4294967040  ;;  %s15_s11 = sadd.s32 1, %s436_s11   ;;  %s610_s6 = smov %s420_s7 }
  0x57   : > { %p12_p5 = scmp.ge.s32.totalorder %s15_s11, 5   ;;  %s611_s7 = smov %s424_s8 }
  0x58   : > { %s612_s8 = smov %s503_s19  ;;  %s613_s9 = smov %s432_s10 }
  0x59   : > { %s614_s10 = smov %s616_s14  ;;  %14 = sbr.rel (!%p12_p5) target bundleno = 5 (0x5), region = 62 }
  0x60   :  { %186 = vsyncpa [#allocation3], 1 }
  0x61   :  { %188 = vsyncpa [#allocation3 + $0x1], 1 }
  0x62   :  { %189 = vsyncpa [#allocation4], 1 }
  0x63   :  { %191 = vsyncpa [#allocation4 + $0x1], 1 }

</bundles_post_ra>
